<compile_context>
chip_gen: v7x
topology: tpu7x:2x2x1
jax: 0.10.0
libtpu: 0.0.40
codegen_flags: <defaults>
</compile_context>

<pallas_src>
import math
import functools

import jax
import jax.numpy as jnp
from jax.experimental import pallas as pl
from jax.experimental.pallas import tpu as pltpu


def _round_up(n, m):
    return ((n + m - 1) // m) * m


_GAIN = {"linear": 1.0, "sigmoid": 1.0, "tanh": 5.0 / 3.0, "relu": math.sqrt(2.0)}


def init_conv_params(key, in_channels, out_channels, kernel_size=1, bias=True,
                     w_init="linear", dtype=jnp.float32):
    """Matches the PyTorch module: xavier_uniform_(weight, gain=calculate_gain(w_init))
    on a [Cout, Cin, K] weight, and the nn.Conv1d default bias init
    U(-1/sqrt(fan_in), 1/sqrt(fan_in)) with fan_in = Cin*K."""
    kw, kb = jax.random.split(key)
    fan_in = in_channels * kernel_size
    fan_out = out_channels * kernel_size
    a = _GAIN[w_init] * math.sqrt(6.0 / (fan_in + fan_out))
    weight = jax.random.uniform(kw, (out_channels, in_channels, kernel_size),
                                dtype, minval=-a, maxval=a)
    params = {"weight": weight}
    if bias:
        bound = 1.0 / math.sqrt(fan_in)
        params["bias"] = jax.random.uniform(kb, (out_channels,), dtype,
                                            minval=-bound, maxval=bound)
    else:
        params["bias"] = None
    return params


def _conv1d_kernel(x_ref, w_ref, b_ref, o_ref, *, num_taps):
    # x_ref: (K, tile_m, Cin_p)   w_ref: (K, Cin_p, Cout_p)
    # b_ref: (1, Cout_p)          o_ref: (tile_m, Cout_p)
    acc = jnp.dot(x_ref[0], w_ref[0], preferred_element_type=jnp.float32)
    for k in range(1, num_taps):           # small static tap loop, unrolled
        acc += jnp.dot(x_ref[k], w_ref[k], preferred_element_type=jnp.float32)
    o_ref[...] = (acc + b_ref[...]).astype(o_ref.dtype)


def conv1d_forward(params, x, *, stride=1, padding=0, dilation=1,
                   tile_m=512, compute_dtype=jnp.bfloat16):
    """x: [B, Cin, L] -> [B, Cout, Lout] (PyTorch nn.Conv1d semantics)."""
    weight = params["weight"]           # [Cout, Cin, K] (PyTorch layout)
    bias = params.get("bias", None)     # [Cout] or None
    B, Cin, L = x.shape
    Cout, Cin_w, K = weight.shape
    assert Cin_w == Cin, "channel mismatch"

    Lout = (L + 2 * padding - dilation * (K - 1) - 1) // stride + 1
    assert Lout > 0, "empty output"
    out_dtype = x.dtype

    # ---- layout plumbing (wrapper side) ------------------------------------
    Cin_p = _round_up(Cin, 128)         # lane-dense feature dims
    Cout_p = _round_up(Cout, 128)
    M = B * Lout
    tm = max(8, min(tile_m, _round_up(M, 8)))   # large row tiles, clamped for tiny M
    num_tiles = pl.cdiv(M, tm)
    M_pad = num_tiles * tm              # pad rows instead of asserting divisibility

    # channels-last + spatial zero padding; cast straight to the MXU input dtype
    # (no wrapper-side f32 blow-up of x).
    xt = jnp.transpose(x, (0, 2, 1)).astype(compute_dtype)   # [B, L, Cin]
    if padding > 0:
        xt = jnp.pad(xt, ((0, 0), (padding, padding), (0, 0)))

    # One strided row view per tap: x_taps[k] = x_padded[:, k*d :: stride, :]
    span = (Lout - 1) * stride + 1
    taps = [xt[:, k * dilation: k * dilation + span: stride, :] for k in range(K)]
    x_taps = jnp.stack(taps, axis=0).reshape(K, M, Cin)
    x_taps = jnp.pad(x_taps, ((0, 0), (0, M_pad - M), (0, Cin_p - Cin)))

    # weight [Cout, Cin, K] -> [K, Cin_p, Cout_p], bf16 MXU inputs
    w = jnp.transpose(weight, (2, 1, 0)).astype(compute_dtype)
    w = jnp.pad(w, ((0, 0), (0, Cin_p - Cin), (0, Cout_p - Cout)))

    if bias is None:
        b2d = jnp.zeros((1, Cout_p), jnp.float32)
    else:
        b2d = jnp.pad(bias.astype(jnp.float32)[None, :],
                      ((0, 0), (0, Cout_p - Cout)))

    kernel = functools.partial(_conv1d_kernel, num_taps=K)

    out2d = pl.pallas_call(
        kernel,
        grid=(num_tiles,),
        in_specs=[
            pl.BlockSpec((K, tm, Cin_p), lambda i: (0, i, 0)),      # per-tap row tile
            pl.BlockSpec((K, Cin_p, Cout_p), lambda i: (0, 0, 0)),  # weights, resident
            pl.BlockSpec((1, Cout_p), lambda i: (0, 0)),            # bias, resident
        ],
        out_specs=pl.BlockSpec((tm, Cout_p), lambda i: (i, 0)),     # lane-dense output
        out_shape=jax.ShapeDtypeStruct((M_pad, Cout_p), jnp.float32),
        compiler_params=pltpu.CompilerParams(
            dimension_semantics=("parallel",),   # no cross-tile state -> megacore OK
        ),
    )(x_taps, w, b2d)

    y = out2d[:M, :Cout].reshape(B, Lout, Cout).transpose(0, 2, 1)
    return y.astype(out_dtype)


def _conv1d_reference(x, weight, bias, *, stride=1, padding=0, dilation=1,
                      compute_dtype=jnp.float32):
    """Pure-JAX reference (precision-matched: inputs cast to compute_dtype,
    f32 accumulation) for correctness checks."""
    y = jax.lax.conv_general_dilated(
        x.astype(compute_dtype), weight.astype(compute_dtype),
        window_strides=(stride,), padding=[(padding, padding)],
        rhs_dilation=(dilation,),
        dimension_numbers=("NCH", "OIH", "NCH"),
        preferred_element_type=jnp.float32)
    if bias is not None:
        y = y + bias.astype(jnp.float32)[None, :, None]
    return y


if __name__ == "__main__":
    key = jax.random.PRNGKey(0)
    k_p1, k_p2, k_p3, k_x = jax.random.split(key, 4)

    B, Cin, Cout, L = 2, 64, 64, 32
    x = jax.random.normal(k_x, (B, Cin, L), dtype=jnp.float32)

    # case 1: module defaults (kernel_size=1, stride=1, padding=0), f32 MXU inputs
    p1 = init_conv_params(k_p1, Cin, Cout, kernel_size=1)
    y1 = jax.block_until_ready(conv1d_forward(p1, x, compute_dtype=jnp.float32))
    r1 = _conv1d_reference(x, p1["weight"], p1["bias"], compute_dtype=jnp.float32)
    assert y1.shape == (B, Cout, L)
    assert jnp.allclose(y1, r1, atol=5e-2, rtol=5e-2), float(jnp.max(jnp.abs(y1 - r1)))

    # case 2: typical TTS conv (kernel_size=3, padding=1), bf16 MXU inputs
    p2 = init_conv_params(k_p2, Cin, Cout, kernel_size=3, w_init="relu")
    y2 = jax.block_until_ready(
        conv1d_forward(p2, x, padding=1, compute_dtype=jnp.bfloat16))
    r2 = _conv1d_reference(x, p2["weight"], p2["bias"], padding=1,
                           compute_dtype=jnp.bfloat16)
    assert y2.shape == (B, Cout, L)
    assert jnp.allclose(y2, r2, atol=5e-2, rtol=5e-2), float(jnp.max(jnp.abs(y2 - r2)))

    # case 3: strided + dilated variant exercises the general tap/index math
    p3 = init_conv_params(k_p3, Cin, Cout, kernel_size=3)
    y3 = jax.block_until_ready(
        conv1d_forward(p3, x, stride=2, padding=2, dilation=2,
                       compute_dtype=jnp.bfloat16))
    r3 = _conv1d_reference(x, p3["weight"], p3["bias"], stride=2, padding=2,
                           dilation=2, compute_dtype=jnp.bfloat16)
    assert y3.shape == r3.shape
    assert jnp.allclose(y3, r3, atol=5e-2, rtol=5e-2), float(jnp.max(jnp.abs(y3 - r3)))

    print("KERNEL_OK")
</pallas_src>

<mosaic_0001>
module attributes {stable_mosaic.version = 11 : i64} {
  func.func @_conv1d_kernel(%arg0: i32, %arg1: memref<1x64x128xf32, #tpu.memory_space<vmem>>, %arg2: memref<1x128x128xf32, #tpu.memory_space<vmem>>, %arg3: memref<1x128xf32, #tpu.memory_space<vmem>>, %arg4: memref<64x128xf32, #tpu.memory_space<vmem>>) attributes {dimension_semantics = [#tpu.dimension_semantics<parallel>], iteration_bounds = array<i64: 1>, scalar_prefetch = 0 : i64, scratch_operands = 0 : i64, tpu.core_type = #tpu.core_type<tc>, window_params = [{transform_indices = @transform_0, window_bounds = array<i64: 1, 64, 128>}, {pipeline_mode = #tpu.pipeline_mode<synchronous>, transform_indices = @transform_1, window_bounds = array<i64: 1, 128, 128>}, {pipeline_mode = #tpu.pipeline_mode<synchronous>, transform_indices = @transform_2, window_bounds = array<i64: 1, 128>}, {transform_indices = @transform_3, window_bounds = array<i64: 64, 128>}]} {
    %c0 = arith.constant 0 : index
    %c0_0 = arith.constant 0 : index
    %c0_1 = arith.constant 0 : index
    %0 = vector.load %arg1[%c0, %c0_0, %c0_1] : memref<1x64x128xf32, #tpu.memory_space<vmem>>, vector<1x64x128xf32>
    %1 = vector.shape_cast %0 : vector<1x64x128xf32> to vector<64x128xf32>
    %c0_2 = arith.constant 0 : index
    %c0_3 = arith.constant 0 : index
    %c0_4 = arith.constant 0 : index
    %2 = vector.load %arg2[%c0_2, %c0_3, %c0_4] : memref<1x128x128xf32, #tpu.memory_space<vmem>>, vector<1x128x128xf32>
    %3 = vector.shape_cast %2 : vector<1x128x128xf32> to vector<128x128xf32>
    %cst = arith.constant dense<0.000000e+00> : vector<64x128xf32>
    %4 = tpu.matmul %1, %3, %cst {dimension_numbers = #tpu.dot_dimension_numbers<[1], [0], [0], [1], [0, 0, 1, 1], [], []>} : vector<64x128xf32>, vector<128x128xf32>, vector<64x128xf32> -> vector<64x128xf32>
    %c0_5 = arith.constant 0 : index
    %c0_6 = arith.constant 0 : index
    %5 = vector.load %arg3[%c0_5, %c0_6] : memref<1x128xf32, #tpu.memory_space<vmem>>, vector<1x128xf32>
    %6 = vector.broadcast %5 : vector<1x128xf32> to vector<64x128xf32>
    %7 = arith.addf %4, %6 : vector<64x128xf32>
    %c0_7 = arith.constant 0 : index
    %c0_8 = arith.constant 0 : index
    %8 = vector.load %arg4[%c0_7, %c0_8] : memref<64x128xf32, #tpu.memory_space<vmem>>, vector<64x128xf32>
    tpu.vector_store %arg4[%c0_7, %c0_8], %7 {strides = array<i32>} : memref<64x128xf32, #tpu.memory_space<vmem>>, vector<64x128xf32>,
    return
  }
  func.func @transform_0(%arg0: i32) -> (i32, i32, i32) {
    %c0_i32 = arith.constant 0 : i32
    %c0_i32_0 = arith.constant 0 : i32
    %c0_i32_1 = arith.constant 0 : i32
    return %c0_i32, %arg0, %c0_i32_0 : i32, i32, i32
  }
  func.func @transform_1(%arg0: i32) -> (i32, i32, i32) {
    %c0_i32 = arith.constant 0 : i32
    %c0_i32_0 = arith.constant 0 : i32
    %c0_i32_1 = arith.constant 0 : i32
    %c0_i32_2 = arith.constant 0 : i32
    return %c0_i32, %c0_i32_0, %c0_i32_1 : i32, i32, i32
  }
  func.func @transform_2(%arg0: i32) -> (i32, i32) {
    %c0_i32 = arith.constant 0 : i32
    %c0_i32_0 = arith.constant 0 : i32
    %c0_i32_1 = arith.constant 0 : i32
    return %c0_i32, %c0_i32_0 : i32, i32
  }
  func.func @transform_3(%arg0: i32) -> (i32, i32) {
    %c0_i32 = arith.constant 0 : i32
    %c0_i32_0 = arith.constant 0 : i32
    return %arg0, %c0_i32 : i32, i32
  }
}

</mosaic_0001>

<bundles_post_ra>
// kernel: tpu_custom_call.1
= control target key start
LH: loop header
LB: loop body
LE: loop exit
PB: predicated region body
PF: predicated region fallthrough
CT: control target
= control target key end

     0   :  { %8 = vsyncpa [#allocation3], 0  ;;  %s472_s0 = inlined_call_operand.hbm [shape: f32[1,64,128], index: 0, kind: input, shape index: {}]   ;;  %s473_s1 = inlined_call_operand.hbm [shape: f32[1,128,128], index: 1, kind: input, shape index: {}]   ;;  %s474_s2 = inlined_call_operand.vmem [shape: f32[1,128], index: 2, kind: input, shape index: {}]   ;;  %s475_s3 = inlined_call_operand.hbm [shape: f32[64,128], index: 3, kind: output, shape index: {}]  }
   0x1   :  { %9 = vsyncpa [#allocation6], 0 }
   0x2   :  { %10 = vsyncpa [#allocation4], 0  ;;  %s399_s12 = smov [#allocation2]   ;;  %s327_s16 = scalar_lea.hbm %s472_s0, 1024 }
   0x3   :  { %s16_s13 = sshll.u32 %s399_s12, 4  ;;  %p328_p0 = scmp.ne.s32.totalorder %s472_s0, %s327_s16  ;;  %s17_s13 = int_to_ptr.vmem [resolvable:$true] %s16_s13 }
   0x4   :  { %p331_p1 = scmp.lt.u32.totalorder %s327_s16, %s472_s0 }
   0x6   :  { %p333_p2 = pnand %p331_p1, %p328_p0 }
   0x8   :  { %336 = shalt.err (!%p333_p2)
}
   0x9   :  { %s337_s21 = scalar_lea.vmem %s17_s13, 1024  ;;  %p342_p4 = scmp.lt.s32.totalorder %s17_s13, %s17_s13 }
   0xa   :  { %p338_p3 = scmp.ne.s32.totalorder %s17_s13, %s337_s21  ;;  %p343_p5 = scmp.lt.s32.totalorder %s337_s21, %s337_s21 }
   0xc   :  { %p344_p6 = por %p343_p5, %p342_p4 }
   0xe   :  { %p345_p7 = pnand %p344_p6, %p338_p3 }
  0x10   :  { %348 = shalt.err (!%p345_p7)
}
  0x11   :  { %s400_s22 = smov 128   ;;  %s401_s23 = smov 8  }
  0x12   :  { %22 = dma.hbm_to_vmem [thread:$0]  %s472_s0, 1024, %s17_s13, [#allocation3], %s400_s22, %s400_s22, %s401_s23  }
  0x13   :  { %s402_s26 = smov [#allocation5]   ;;  %s349_s30 = scalar_lea.hbm %s473_s1, 2048 }
  0x14   :  { %s28_s27 = sshll.u32 %s402_s26, 4  ;;  %p350_p8 = scmp.ne.s32.totalorder %s473_s1, %s349_s30  ;;  %s29_s27 = int_to_ptr.vmem [resolvable:$true] %s28_s27 }
  0x15   :  { %p353_p9 = scmp.lt.u32.totalorder %s349_s30, %s473_s1 }
  0x17   :  { %p355_p10 = pnand %p353_p9, %p350_p8 }
  0x19   :  { %358 = shalt.err (!%p355_p10)
}
  0x1a   :  { %s359_s8 = scalar_lea.vmem %s29_s27, 2048  ;;  %p364_p12 = scmp.lt.s32.totalorder %s29_s27, %s29_s27 }
  0x1b   :  { %p360_p11 = scmp.ne.s32.totalorder %s29_s27, %s359_s8  ;;  %p365_p13 = scmp.lt.s32.totalorder %s359_s8, %s359_s8 }
  0x1d   :  { %p366_p0 = por %p365_p13, %p364_p12 }
  0x1f   :  { %p367_p1 = pnand %p366_p0, %p360_p11 }
  0x21   :  { %370 = shalt.err (!%p367_p1)
}
  0x22   :  { %34 = dma.hbm_to_vmem [thread:$0]  %s473_s1, 2048, %s29_s27, [#allocation6], %s400_s22, %s400_s22, %s401_s23  }
  0x23   :  { %393 = dma.done.wait [#allocation3], 1024  }
  0x24   :  { %394 = vsyncadd [#allocation3], 4294966272 }
  0x25   :  { %395 = dma.done.wait [#allocation6], 2048  }
  0x26   :  { %396 = vsyncadd [#allocation6], 4294965248  ;;  %v51_v0 = vld [vmem:[#allocation5] sm:$0xff]  ;;  %v52_v1 = vld [vmem:[#allocation5 + $0x8] sm:$0xff]  ;;  %s403_s11 = smov [#allocation7]  }
  0x27   :  { %v53_v2 = vld [vmem:[#allocation5 + $0x10] sm:$0xff]  ;;  %v274_v3 = vpack.c.bf16 %v52_v1, %v51_v0  ;;  %v54_v4 = vld [vmem:[#allocation5 + $0x18] sm:$0xff]  ;;  %v55_v6 = vld [vmem:[#allocation5 + $0x20] sm:$0xff]  ;;  %s192_s12 = sshll.u32 %s403_s11, 4  ;;  %s193_s12 = int_to_ptr.vmem [resolvable:$true] %s192_s12 }
  0x28   :  { %v278_v5 = vpack.c.bf16 %v54_v4, %v53_v2  ;;  %v56_v7 = vld [vmem:[#allocation5 + $0x28] sm:$0xff]  ;;  %v43_v9 = vld [vmem:[#allocation2] sm:$0xff]  ;;  %v57_v11 = vld [vmem:[#allocation5 + $0x30] sm:$0xff]  ;;  %p376_p3 = scmp.lt.s32.totalorder %s193_s12, %s193_s12 }
  0x29   :  { %275 = vmatprep.subr.bf16.mxu0 %v274_v3  ;;  %306 = vmatprep.subr.bf16.mxu1 %v274_v3  ;;  %v282_v8 = vpack.c.bf16 %v56_v7, %v55_v6  ;;  %v47_v10 = vld [vmem:[#allocation2 + $0x20] sm:$0xff]  ;;  %v58_v12 = vld [vmem:[#allocation5 + $0x38] sm:$0xff]  ;;  %v60_v15 = vld [vmem:[#allocation5 + $0x48] sm:$0xff] }
  0x2a   :  { %277 = vmatpush3.bf16.msra.mxu0 %v274_v3  ;;  %314 = vmatpush3.bf16.msra.mxu1 %v274_v3  ;;  %v286_v13 = vpack.c.bf16 %v58_v12, %v57_v11  ;;  %v59_v14 = vld [vmem:[#allocation5 + $0x40] sm:$0xff]  ;;  %v61_v17 = vld [vmem:[#allocation5 + $0x50] sm:$0xff]  ;;  %v62_v18 = vld [vmem:[#allocation5 + $0x58] sm:$0xff] }
  0x2b   :  { %279 = vmatprep.subr.bf16.mxu0 %v278_v5  ;;  %307 = vmatprep.subr.bf16.mxu1 %v278_v5  ;;  %v290_v16 = vpack.c.bf16 %v60_v15, %v59_v14  ;;  %v294_v19 = vpack.c.bf16 %v62_v18, %v61_v17  ;;  %v63_v20 = vld [vmem:[#allocation5 + $0x60] sm:$0xff]  ;;  %v64_v21 = vld [vmem:[#allocation5 + $0x68] sm:$0xff]  ;;  %v65_v23 = vld [vmem:[#allocation5 + $0x70] sm:$0xff] }
  0x2c   :  { %262 = vmatprep.mubr.f32.mxu0 %v43_v9  ;;  %268 = vmatprep.mubr.f32.mxu1 %v47_v10  ;;  %v298_v22 = vpack.c.bf16 %v64_v21, %v63_v20  ;;  %v66_v24 = vld [vmem:[#allocation5 + $0x78] sm:$0xff]  ;;  %v44_v26 = vld [vmem:[#allocation2 + $0x8] sm:$0xff]  ;;  %v45_v28 = vld [vmem:[#allocation2 + $0x10] sm:$0xff] }
  0x2d   :  { %v302_v25 = vpack.c.bf16 %v66_v24, %v65_v23  ;;  %v48_v27 = vld [vmem:[#allocation2 + $0x28] sm:$0xff]  ;;  %v49_v29 = vld [vmem:[#allocation2 + $0x30] sm:$0xff]  ;;  %v46_v30 = vld [vmem:[#allocation2 + $0x18] sm:$0xff] }
  0x2e   :  { %281 = vmatpush3.bf16.msra.mxu0 %v278_v5  ;;  %315 = vmatpush3.bf16.msra.mxu1 %v278_v5  ;;  %v50_v31 = vld [vmem:[#allocation2 + $0x38] sm:$0xff]  ;;  %v205_v32 = vld [vmem:[%s474_s2] ss:$0 sm:$0xff]  ;;  %s371_s2 = scalar_lea.vmem %s193_s12, 1024 }
  0x2f   :  { %283 = vmatprep.subr.bf16.mxu0 %v282_v8  ;;  %308 = vmatprep.subr.bf16.mxu1 %v282_v8  ;;  %p372_p2 = scmp.ne.s32.totalorder %s193_s12, %s371_s2  ;;  %p377_p4 = scmp.lt.s32.totalorder %s371_s2, %s371_s2 }
  0x31   :  { %p378_p5 = por %p377_p4, %p376_p3 }
  0x32   :  { %285 = vmatpush3.bf16.msra.mxu0 %v282_v8  ;;  %316 = vmatpush3.bf16.msra.mxu1 %v282_v8 }
  0x33   :  { %287 = vmatprep.subr.bf16.mxu0 %v286_v13  ;;  %309 = vmatprep.subr.bf16.mxu1 %v286_v13  ;;  %p379_p6 = pnand %p378_p5, %p372_p2 }
  0x36   :  { %289 = vmatpush3.bf16.msra.mxu0 %v286_v13  ;;  %317 = vmatpush3.bf16.msra.mxu1 %v286_v13 }
  0x37   :  { %291 = vmatprep.subr.bf16.mxu0 %v290_v16  ;;  %310 = vmatprep.subr.bf16.mxu1 %v290_v16 }
  0x3a   :  { %293 = vmatpush3.bf16.msra.mxu0 %v290_v16  ;;  %318 = vmatpush3.bf16.msra.mxu1 %v290_v16 }
  0x3b   :  { %295 = vmatprep.subr.bf16.mxu0 %v294_v19  ;;  %311 = vmatprep.subr.bf16.mxu1 %v294_v19 }
  0x3e   :  { %297 = vmatpush3.bf16.msra.mxu0 %v294_v19  ;;  %319 = vmatpush3.bf16.msra.mxu1 %v294_v19 }
  0x3f   :  { %299 = vmatprep.subr.bf16.mxu0 %v298_v22  ;;  %312 = vmatprep.subr.bf16.mxu1 %v298_v22 }
  0x42   :  { %301 = vmatpush3.bf16.msra.mxu0 %v298_v22  ;;  %320 = vmatpush3.bf16.msra.mxu1 %v298_v22 }
  0x43   :  { %303 = vmatprep.subr.bf16.mxu0 %v302_v25  ;;  %313 = vmatprep.subr.bf16.mxu1 %v302_v25 }
  0x46   :  { %305 = vmatpush3.bf16.msra.mxu0 %v302_v25  ;;  %321 = vmatpush3.bf16.msra.mxu1 %v302_v25 }
  0x49   :  { %263 = vmatmul.mubr.f32.vlgmr.msra.gmra.mrb[0].mxu0 %v44_v26  ;;  %269 = vmatmul.mubr.f32.vlgmr.msra.gmra.mrb[0].mxu1 %v48_v27 }
  0x4a   :  { %265 = vmatprep.mubr.f32.mxu0 %v45_v28  ;;  %271 = vmatprep.mubr.f32.mxu1 %v49_v29 }
  0x4d   :  { %266 = vmatmul.mubr.f32.gmra.mrb[2].mxu0 %v46_v30  ;;  %272 = vmatmul.mubr.f32.gmra.mrb[2].mxu1 %v50_v31 }
 0x11c   :  { %v264_v33 = vpop.f32.mrb[0].mxu0  ;;  %v270_v34 = vpop.f32.mrb[0].mxu1 }
 0x11d   :  { %v146_v35 = vadd.f32 %v264_v33, %v205_v32  ;;  %v166_v36 = vadd.f32 %v270_v34, %v205_v32  ;;  %v140_v37 = vpop.f32.mrb[1].mxu0  ;;  %v160_v38 = vpop.f32.mrb[1].mxu1 }
 0x11e   :  { %v141_v39 = vadd.f32 %v205_v32, %v140_v37  ;;  %v161_v40 = vadd.f32 %v205_v32, %v160_v38 }
 0x11f   :  { %180 = vst [vmem:[#allocation7 + $0x8] sm:$0xff] %v146_v35  ;;  %184 = vst [vmem:[#allocation7 + $0x28] sm:$0xff] %v166_v36 }
 0x120   :  { %179 = vst [vmem:[#allocation7] sm:$0xff] %v141_v39  ;;  %183 = vst [vmem:[#allocation7 + $0x20] sm:$0xff] %v161_v40  ;;  %v267_v41 = vpop.f32.mrb[2].mxu0  ;;  %v273_v42 = vpop.f32.mrb[2].mxu1 }
 0x121   :  { %v156_v43 = vadd.f32 %v267_v41, %v205_v32  ;;  %v176_v44 = vadd.f32 %v273_v42, %v205_v32  ;;  %v150_v45 = vpop.f32.mrb[3].mxu0  ;;  %v170_v46 = vpop.f32.mrb[3].mxu1 }
 0x122   :  { %v151_v47 = vadd.f32 %v205_v32, %v150_v45  ;;  %v171_v48 = vadd.f32 %v205_v32, %v170_v46 }
 0x123   :  { %182 = vst [vmem:[#allocation7 + $0x18] sm:$0xff] %v156_v43  ;;  %186 = vst [vmem:[#allocation7 + $0x38] sm:$0xff] %v176_v44 }
 0x124   :  { %181 = vst [vmem:[#allocation7 + $0x10] sm:$0xff] %v151_v47  ;;  %185 = vst [vmem:[#allocation7 + $0x30] sm:$0xff] %v171_v48 }
 0x125   :  { %382 = shalt.err (!%p379_p6)
}
 0x126   :  { %s383_s15 = scalar_lea.hbm %s475_s3, 1024 }
 0x127   :  { %p384_p7 = scmp.ne.s32.totalorder %s475_s3, %s383_s15  ;;  %p387_p8 = scmp.lt.u32.totalorder %s383_s15, %s475_s3 }
 0x129   :  { %p389_p9 = pnand %p387_p8, %p384_p7 }
 0x12b   :  { %392 = shalt.err (!%p389_p9)
}
 0x12c   :  { %198 = dma.vmem_to_hbm [thread:$0]  %s193_s12, 1024, %s475_s3, [#allocation4], %s400_s22, %s400_s22, %s401_s23  }
 0x12d   :  { %397 = dma.done.wait [#allocation4], 1024  }
 0x12e   :  { %398 = vsyncadd [#allocation4], 4294966272 }
 0x12f   :  { %202 = vsyncpa [#allocation3], 1 }
 0x130   :  { %203 = vsyncpa [#allocation6], 1 }
 0x131   :  { %204 = vsyncpa [#allocation4], 1 }

</bundles_post_ra>
